<compile_context>
chip_gen: v6e
topology: v6e:2x2x1
jax: 0.10.0
libtpu: 0.0.40
codegen_flags: <defaults>
</compile_context>

<pallas_src>
import functools
import math

import jax
import jax.numpy as jnp
from jax import lax
from jax.experimental import pallas as pl
from jax.experimental.pallas import tpu as pltpu


# ---------------------------------------------------------------------------
# Kernel 1: fused QKV projection   (B*T, E) @ (E, 3H) -> (B*T, 3H)
# ---------------------------------------------------------------------------
def _qkv_proj_kernel(x_ref, w_ref, qkv_ref):
    qkv_ref[...] = jnp.dot(
        x_ref[...], w_ref[...], preferred_element_type=jnp.float32
    ).astype(qkv_ref.dtype)


# ---------------------------------------------------------------------------
# Kernel 2: flash attention with online softmax
# ---------------------------------------------------------------------------
def _flash_attn_kernel(q_ref, k_ref, v_ref, o_ref, m_sc, l_sc, acc_sc, *, causal):
    qi = pl.program_id(1)
    kvi = pl.program_id(2)

    @pl.when(kvi == 0)
    def _init():
        m_sc[...] = jnp.full(m_sc.shape, -jnp.inf, dtype=jnp.float32)
        l_sc[...] = jnp.zeros(l_sc.shape, dtype=jnp.float32)
        acc_sc[...] = jnp.zeros(acc_sc.shape, dtype=jnp.float32)

    def _update(masked):
        q = q_ref[...]                      # (Bb, tq, H), native dtype
        k = k_ref[...]                      # (Bb, tkv, H)
        # Contract over H for both operands -> no materialized k transpose.
        s = jnp.einsum(
            "bqh,bkh->bqk", q, k, preferred_element_type=jnp.float32
        )                                   # (Bb, tq, tkv) f32
        if masked:
            # Only the diagonal tile (kvi == qi, tq == tkv) is masked; the row
            # and column offsets cancel, so the mask is a constant local tril.
            tq, tkv = s.shape[1], s.shape[2]
            rows = lax.broadcasted_iota(jnp.int32, (tq, tkv), 0)
            cols = lax.broadcasted_iota(jnp.int32, (tq, tkv), 1)
            s = jnp.where((cols <= rows)[None], s, -1e30)

        m_prev = m_sc[...]
        m_new = jnp.maximum(m_prev, jnp.max(s, axis=-1, keepdims=True))
        alpha = jnp.exp(m_prev - m_new)
        p = jnp.exp(s - m_new)
        l_sc[...] = alpha * l_sc[...] + jnp.sum(p, axis=-1, keepdims=True)
        acc_sc[...] = alpha * acc_sc[...] + jnp.einsum(
            "bqk,bkh->bqh",
            p.astype(v_ref.dtype), v_ref[...],
            preferred_element_type=jnp.float32,
        )
        m_sc[...] = m_new

    if causal:
        @pl.when(kvi < qi)          # fully-unmasked tile: no mask work
        def _off_diag():
            _update(masked=False)

        @pl.when(kvi == qi)         # diagonal tile: local tril mask
        def _diag():
            _update(masked=True)
        # kvi > qi: fully-masked tile -> skipped entirely (no MXU/VALU work)
    else:
        _update(masked=False)

    @pl.when(kvi == pl.num_programs(2) - 1)
    def _finalize():
        inv_l = pl.reciprocal(l_sc[...], approx=True)     # EUP, not VALU divide
        o_ref[...] = (acc_sc[...] * inv_l).astype(o_ref.dtype)


# ---------------------------------------------------------------------------
# Wrapper
# ---------------------------------------------------------------------------
def _pick_tile(n, candidates):
    for c in candidates:
        if n % c == 0:
            return c
    return n


def _pick_batch_block(b, tile):
    bb = max(1, min(b, 1024 // max(tile, 1)))
    while b % bb:
        bb -= 1
    return bb


def self_attention_head(x, w_query, w_key, w_value, *, mask=True):
    """x: (B, T, E); w_*: (H, E) PyTorch-Linear-style weights (bias=False)."""
    B, T, E = x.shape
    H = w_query.shape[0]

    # NOTE: the PyTorch module scales by embed_size ** 0.5 (not head_size).
    scale = 1.0 / math.sqrt(float(E))
    # Fuse the three projections into one (E, 3H) weight; fold the scale into
    # the query columns. Weights are cast to the activation dtype so bf16
    # activations run the MXU in native bf16.
    wqkv = jnp.concatenate(
        [
            w_query.T.astype(jnp.float32) * scale,
            w_key.T.astype(jnp.float32),
            w_value.T.astype(jnp.float32),
        ],
        axis=1,
    ).astype(x.dtype)                                   # (E, 3H)

    # ---- kernel 1: fused QKV projection over (B*T, E) ----
    M = B * T
    tm = _pick_tile(M, (512, 256, 128))
    x2 = x.reshape(M, E)
    qkv = pl.pallas_call(
        _qkv_proj_kernel,
        out_shape=jax.ShapeDtypeStruct((M, 3 * H), x.dtype),
        grid_spec=pltpu.PrefetchScalarGridSpec(
            num_scalar_prefetch=0,
            grid=(M // tm,),
            in_specs=[
                pl.BlockSpec((tm, E), lambda m: (m, 0)),
                pl.BlockSpec((E, 3 * H), lambda m: (0, 0)),
            ],
            out_specs=pl.BlockSpec((tm, 3 * H), lambda m: (m, 0)),
        ),
        compiler_params=pltpu.CompilerParams(
            dimension_semantics=("parallel",),
            vmem_limit_bytes=32 * 1024 * 1024,          # explicit (v7x-safe)
        ),
    )(x2, wqkv)
    qkv = qkv.reshape(B, T, 3 * H)
    q = qkv[:, :, :H]
    k = qkv[:, :, H:2 * H]
    v = qkv[:, :, 2 * H:]

    # ---- kernel 2: flash attention over (batch-block, q-tile, kv-tile) ----
    tile = 128 if T % 128 == 0 else T                   # tq == tkv
    Bb = _pick_batch_block(B, tile)                     # amortize tiny tiles

    q_index = lambda b, qi, kvi: (b, qi, 0)
    if mask:
        # Skipped (above-diagonal) steps re-map to the already-fetched block,
        # so their DMA is elided along with their compute.
        kv_index = lambda b, qi, kvi: (b, jnp.minimum(qi, kvi), 0)
    else:
        kv_index = lambda b, qi, kvi: (b, kvi, 0)

    kernel = functools.partial(_flash_attn_kernel, causal=mask)
    out = pl.pallas_call(
        kernel,
        out_shape=jax.ShapeDtypeStruct((B, T, H), x.dtype),
        grid_spec=pltpu.PrefetchScalarGridSpec(
            num_scalar_prefetch=0,
            grid=(B // Bb, T // tile, T // tile),
            in_specs=[
                pl.BlockSpec((Bb, tile, H), q_index),
                pl.BlockSpec((Bb, tile, H), kv_index),
                pl.BlockSpec((Bb, tile, H), kv_index),
            ],
            out_specs=pl.BlockSpec((Bb, tile, H), q_index),
            scratch_shapes=[
                pltpu.VMEM((Bb, tile, 1), jnp.float32),   # running max m
                pltpu.VMEM((Bb, tile, 1), jnp.float32),   # running sum l
                pltpu.VMEM((Bb, tile, H), jnp.float32),   # output accumulator
            ],
        ),
        compiler_params=pltpu.CompilerParams(
            dimension_semantics=("parallel", "parallel", "arbitrary"),
            vmem_limit_bytes=32 * 1024 * 1024,            # explicit (v7x-safe)
        ),
    )(q, k, v)
    return out


# ---------------------------------------------------------------------------
# Pure-JAX reference (mirrors the PyTorch forward)
# ---------------------------------------------------------------------------
def _reference(x, w_query, w_key, w_value, *, mask=True):
    q = x @ w_query.T
    k = x @ w_key.T
    v = x @ w_value.T
    E = x.shape[-1]
    s = (q @ jnp.swapaxes(k, -2, -1)) / math.sqrt(float(E))
    if mask:
        T = x.shape[1]
        tril = jnp.tril(jnp.ones((T, T), dtype=bool))
        s = jnp.where(tril[None], s, -jnp.inf)
    p = jax.nn.softmax(s, axis=-1)
    return p @ v


if __name__ == "__main__":
    def run_case(B, T, E, H, use_mask):
        key = jax.random.PRNGKey(0)
        kx, kq, kk, kv = jax.random.split(key, 4)
        bound = 1.0 / math.sqrt(E)
        x = jax.random.normal(kx, (B, T, E), dtype=jnp.float32)
        w_query = jax.random.uniform(kq, (H, E), jnp.float32, -bound, bound)
        w_key = jax.random.uniform(kk, (H, E), jnp.float32, -bound, bound)
        w_value = jax.random.uniform(kv, (H, E), jnp.float32, -bound, bound)

        out = self_attention_head(x, w_query, w_key, w_value, mask=use_mask)
        out = jax.block_until_ready(out)
        ref = _reference(x, w_query, w_key, w_value, mask=use_mask)
        assert out.shape == (B, T, H)
        # approx reciprocal in the softmax normalization -> slightly relaxed tol
        assert jnp.allclose(out, ref, atol=2e-3, rtol=2e-3), float(
            jnp.max(jnp.abs(out - ref))
        )

    # Module-sized small example: batch=2, ctx/seq=8, embed=32, head=16
    run_case(2, 8, 32, 16, True)
    run_case(2, 8, 32, 16, False)
    # Exercise the tiled flash path (tile=128, causal tile skipping)
    run_case(2, 256, 64, 16, True)

    print("KERNEL_OK")
</pallas_src>

<mosaic_0001>
module attributes {stable_mosaic.version = 11 : i64} {
  func.func @_qkv_proj_kernel(%arg0: i32, %arg1: memref<16x32xf32, #tpu.memory_space<vmem>>, %arg2: memref<32x48xf32, #tpu.memory_space<vmem>>, %arg3: memref<16x48xf32, #tpu.memory_space<vmem>>) attributes {dimension_semantics = [#tpu.dimension_semantics<parallel>], iteration_bounds = array<i64: 1>, scalar_prefetch = 0 : i64, scratch_operands = 0 : i64, tpu.core_type = #tpu.core_type<tc>, window_params = [{transform_indices = @transform_0, window_bounds = array<i64: 16, 32>}, {pipeline_mode = #tpu.pipeline_mode<synchronous>, transform_indices = @transform_1, window_bounds = array<i64: 32, 48>}, {transform_indices = @transform_2, window_bounds = array<i64: 16, 48>}]} {
    %c0 = arith.constant 0 : index
    %c0_0 = arith.constant 0 : index
    %0 = vector.load %arg1[%c0, %c0_0] : memref<16x32xf32, #tpu.memory_space<vmem>>, vector<16x32xf32>
    %c0_1 = arith.constant 0 : index
    %c0_2 = arith.constant 0 : index
    %1 = vector.load %arg2[%c0_1, %c0_2] : memref<32x48xf32, #tpu.memory_space<vmem>>, vector<32x48xf32>
    %cst = arith.constant dense<0.000000e+00> : vector<16x48xf32>
    %2 = tpu.matmul %0, %1, %cst {dimension_numbers = #tpu.dot_dimension_numbers<[1], [0], [0], [1], [0, 0, 1, 1], [], []>} : vector<16x32xf32>, vector<32x48xf32>, vector<16x48xf32> -> vector<16x48xf32>
    %c0_3 = arith.constant 0 : index
    %c0_4 = arith.constant 0 : index
    %3 = vector.load %arg3[%c0_3, %c0_4] : memref<16x48xf32, #tpu.memory_space<vmem>>, vector<16x48xf32>
    tpu.vector_store %arg3[%c0_3, %c0_4], %2 {strides = array<i32>} : memref<16x48xf32, #tpu.memory_space<vmem>>, vector<16x48xf32>,
    return
  }
  func.func @transform_0(%arg0: i32) -> (i32, i32) {
    %c0_i32 = arith.constant 0 : i32
    %c0_i32_0 = arith.constant 0 : i32
    return %arg0, %c0_i32 : i32, i32
  }
  func.func @transform_1(%arg0: i32) -> (i32, i32) {
    %c0_i32 = arith.constant 0 : i32
    %c0_i32_0 = arith.constant 0 : i32
    %c0_i32_1 = arith.constant 0 : i32
    return %c0_i32, %c0_i32_0 : i32, i32
  }
  func.func @transform_2(%arg0: i32) -> (i32, i32) {
    %c0_i32 = arith.constant 0 : i32
    %c0_i32_0 = arith.constant 0 : i32
    return %arg0, %c0_i32 : i32, i32
  }
}

</mosaic_0001>

<bundles_post_ra>
// kernel: tpu_custom_call.1
= control target key start
LH: loop header
LB: loop body
LE: loop exit
PB: predicated region body
PF: predicated region fallthrough
CT: control target
= control target key end

     0   :  { %7 = vsyncpa [#allocation3], 0  ;;  %s279_s0 = inlined_call_operand.hbm [shape: f32[16,32], index: 0, kind: input, shape index: {}]   ;;  %s280_s1 = inlined_call_operand.hbm [shape: f32[32,48], index: 1, kind: input, shape index: {}]   ;;  %s281_s2 = inlined_call_operand.hbm [shape: f32[16,48], index: 2, kind: output, shape index: {}]  }
   0x1   :  { %8 = vsyncpa [#allocation6], 0 }
   0x2   :  { %9 = vsyncpa [#allocation4], 0  ;;  %s239_s9 = smov [#allocation2]  }
   0x3   :  { %s15_s10 = sshll.u32 %s239_s9, 4  ;;  %s16_s10 = int_to_ptr.vmem [resolvable:$true] %s15_s10 }
   0x4   :  { %s181_s11 = scalar_lea.vmem %s16_s10, 256  ;;  %p186_p1 = scmp.lt.s32.totalorder %s16_s10, %s16_s10 }
   0x5   :  { %p182_p0 = scmp.ne.s32.totalorder %s16_s10, %s181_s11  ;;  %p187_p2 = scmp.lt.s32.totalorder %s181_s11, %s181_s11 }
   0x7   :  { %p188_p3 = por %p187_p2, %p186_p1 }
   0x9   :  { %p189_p4 = pnand %p188_p3, %p182_p0 }
   0xb   :  { %192 = shalt.err (!%p189_p4)
}
   0xc   :  { %s240_s12 = smov 128   ;;  %s241_s13 = smov 8  }
   0xd   :  { %21 = dma.hbm_to_vmem [thread:$0]  %s279_s0, 256, %s16_s10, [#allocation3], %s240_s12, %s240_s12, %s241_s13  }
   0xe   :  { %s242_s16 = smov [#allocation5]  }
   0xf   :  { %s27_s17 = sshll.u32 %s242_s16, 4  ;;  %s28_s17 = int_to_ptr.vmem [resolvable:$true] %s27_s17 }
  0x10   :  { %s201_s18 = scalar_lea.vmem %s28_s17, 512  ;;  %p206_p6 = scmp.lt.s32.totalorder %s28_s17, %s28_s17 }
  0x11   :  { %p202_p5 = scmp.ne.s32.totalorder %s28_s17, %s201_s18  ;;  %p207_p7 = scmp.lt.s32.totalorder %s201_s18, %s201_s18 }
  0x13   :  { %p208_p8 = por %p207_p7, %p206_p6 }
  0x15   :  { %p209_p9 = pnand %p208_p8, %p202_p5 }
  0x17   :  { %212 = shalt.err (!%p209_p9)
}
  0x18   :  { %33 = dma.hbm_to_vmem [thread:$0]  %s280_s1, 512, %s28_s17, [#allocation6], %s240_s12, %s240_s12, %s241_s13  }
  0x19   :  { %233 = dma.done.wait [#allocation3], 256  }
  0x1a   :  { %234 = vsyncadd [#allocation3], 4294967040 }
  0x1b   :  { %235 = dma.done.wait [#allocation6], 512  }
  0x1c   :  { %236 = vsyncadd [#allocation6], 4294966784  ;;  %vm46_vm0 = vcmask 261120   ;;  %v45_v0 = vld [vmem:[#allocation5 + $0x18] sm:$0xff]  ;;  %v44_v1 = vld [vmem:[#allocation5 + $0x10] sm:$0xff]  ;;  %vm128_vm1 = vcmask 392192  }
  0x1d   :  { %157 = vmatprep.subr.mxu0 %v45_v0  ;;  %v40_v2 = vld [vmem:[#allocation2] sm:$0xff]  ;;  %v43_v3 = vld [vmem:[#allocation5 + $0x8] sm:$0xff]  ;;  %v42_v4 = vld [vmem:[#allocation5] sm:$0xff]  ;;  %s243_s0 = smov [#allocation7]  }
  0x1e   :  { %158 = vmatpush3.msra.mxu0 %v45_v0  ;;  %165 = vmatprep.mubr.msk.f32.mxu0 %vm46_vm0, %v40_v2  ;;  %v41_v5 = vld [vmem:[#allocation2 + $0x8] sm:$0xff]  ;;  %s136_s1 = sshll.u32 %s243_s0, 4  ;;  %s137_s1 = int_to_ptr.vmem [resolvable:$true] %s136_s1 }
  0x1f   :  { %159 = vmatprep.subr.mxu0 %v44_v1  ;;  %s213_s21 = scalar_lea.vmem %s137_s1, 256  ;;  %p218_p11 = scmp.lt.s32.totalorder %s137_s1, %s137_s1 }
  0x20   :  { %160 = vmatpush3.msra.mxu0 %v44_v1  ;;  %p214_p10 = scmp.ne.s32.totalorder %s137_s1, %s213_s21  ;;  %p219_p12 = scmp.lt.s32.totalorder %s213_s21, %s213_s21 }
  0x21   :  { %161 = vmatprep.subr.mxu0 %v43_v3 }
  0x22   :  { %162 = vmatpush3.msra.mxu0 %v43_v3  ;;  %p220_p13 = por %p219_p12, %p218_p11 }
  0x23   :  { %163 = vmatprep.subr.mxu0 %v42_v4 }
  0x24   :  { %164 = vmatpush3.msra.mxu0 %v42_v4  ;;  %p221_p0 = pnand %p220_p13, %p214_p10 }
  0x25   :  { %166 = vmatmul.mubr.msk.f32.vlgmr.msra.gmra.mxu0 %vm46_vm0, %v41_v5 }
  0xe5   :  { %v167_v6 = vpop.f32.mrf.mxu0 }
  0xe6   :  { %130 = vst.msk [vmem:[#allocation7 + $0x8] sm:$0xff] %vm128_vm1, %v167_v6 }
  0xe7   :  { %v119_v7 = vpop.f32.mrf.mxu0 }
  0xe8   :  { %129 = vst.msk [vmem:[#allocation7] sm:$0xff] %vm128_vm1, %v119_v7 }
  0xe9   :  { %224 = shalt.err (!%p221_p0)
}
  0xea   :  { %142 = dma.vmem_to_hbm [thread:$0]  %s137_s1, 256, %s281_s2, [#allocation4], %s240_s12, %s240_s12, %s241_s13  }
  0xeb   :  { %237 = dma.done.wait [#allocation4], 256  }
  0xec   :  { %238 = vsyncadd [#allocation4], 4294967040 }
  0xed   :  { %146 = vsyncpa [#allocation3], 1 }
  0xee   :  { %147 = vsyncpa [#allocation6], 1 }
  0xef   :  { %148 = vsyncpa [#allocation4], 1 }

</bundles_post_ra>
